<compile_context>
chip_gen: v7x
topology: tpu7x:2x2x1
jax: 0.10.0
libtpu: 0.0.40
codegen_flags: <defaults>
</compile_context>

<pallas_src>
import jax
import jax.numpy as jnp
from jax.experimental import pallas as pl
from jax.experimental.pallas import tpu as pltpu

M = 32          # matrix side
REPEATS = 7     # number of concatenated copies along dim 0


def mm_cat_kernel(x_ref, o_ref):
    # x_ref: (M, M) input, fully resident in VMEM (fetched once).
    # o_ref: (REPEATS*M, M) output, fully resident in VMEM.
    x = x_ref[...]
    # Single MXU pass, f32 accumulation.
    y = jnp.dot(x, x, preferred_element_type=jnp.float32).astype(o_ref.dtype)
    # Replicate 7x along rows with unrolled static-slice stores: y stays live
    # in its vregs; no (224,32) temporary, no tile/concatenate relayout.
    for r in range(REPEATS):
        o_ref[r * M:(r + 1) * M, :] = y


def model_forward(x1: jax.Array) -> jax.Array:
    m, n = x1.shape
    assert m == n == M
    return pl.pallas_call(
        mm_cat_kernel,
        out_shape=jax.ShapeDtypeStruct((REPEATS * M, M), x1.dtype),
        in_specs=[pl.BlockSpec(memory_space=pltpu.MemorySpace.VMEM)],
        out_specs=pl.BlockSpec(memory_space=pltpu.MemorySpace.VMEM),
        cost_estimate=pl.CostEstimate(
            flops=2 * M * M * M,
            bytes_accessed=M * M * 4 + REPEATS * M * M * 4,
            transcendentals=0,
        ),
    )(x1)


if __name__ == "__main__":
    key = jax.random.PRNGKey(0)
    x1 = jax.random.normal(key, (M, M), dtype=jnp.float32)

    out = model_forward(x1)
    jax.block_until_ready(out)

    # Reference check in plain JAX (matches torch.cat([x1 @ x1]*7, dim=0)).
    ref = jnp.concatenate([x1 @ x1 for _ in range(REPEATS)], axis=0)
    assert out.shape == (REPEATS * M, M)
    assert jnp.allclose(out, ref, atol=1e-4, rtol=1e-4)

    print("KERNEL_OK")
</pallas_src>

<mosaic_0001>
module attributes {stable_mosaic.version = 11 : i64} {
  func.func @mm_cat_kernel(%arg0: memref<32x32xf32, #tpu.memory_space<vmem>>, %arg1: memref<224x32xf32, #tpu.memory_space<vmem>>) attributes {dimension_semantics = [], scalar_prefetch = 0 : i64, scratch_operands = 0 : i64, tpu.core_type = #tpu.core_type<tc>} {
    %c0 = arith.constant 0 : index
    %c0_0 = arith.constant 0 : index
    %0 = vector.load %arg0[%c0, %c0_0] : memref<32x32xf32, #tpu.memory_space<vmem>>, vector<32x32xf32>
    %cst = arith.constant dense<0.000000e+00> : vector<32x32xf32>
    %1 = tpu.matmul %0, %0, %cst {dimension_numbers = #tpu.dot_dimension_numbers<[1], [0], [0], [1], [0, 0, 1, 1], [], []>} : vector<32x32xf32>, vector<32x32xf32>, vector<32x32xf32> -> vector<32x32xf32>
    %c0_1 = arith.constant 0 : index
    %c0_2 = arith.constant 0 : index
    %2 = vector.load %arg1[%c0_1, %c0_2] : memref<224x32xf32, #tpu.memory_space<vmem>>, vector<32x32xf32>
    tpu.vector_store %arg1[%c0_1, %c0_2], %1 {strides = array<i32>} : memref<224x32xf32, #tpu.memory_space<vmem>>, vector<32x32xf32>,
    %c32 = arith.constant 32 : index
    %c0_3 = arith.constant 0 : index
    %3 = vector.load %arg1[%c32, %c0_3] : memref<224x32xf32, #tpu.memory_space<vmem>>, vector<32x32xf32>
    tpu.vector_store %arg1[%c32, %c0_3], %1 {strides = array<i32>} : memref<224x32xf32, #tpu.memory_space<vmem>>, vector<32x32xf32>,
    %c64 = arith.constant 64 : index
    %c0_4 = arith.constant 0 : index
    %4 = vector.load %arg1[%c64, %c0_4] : memref<224x32xf32, #tpu.memory_space<vmem>>, vector<32x32xf32>
    tpu.vector_store %arg1[%c64, %c0_4], %1 {strides = array<i32>} : memref<224x32xf32, #tpu.memory_space<vmem>>, vector<32x32xf32>,
    %c96 = arith.constant 96 : index
    %c0_5 = arith.constant 0 : index
    %5 = vector.load %arg1[%c96, %c0_5] : memref<224x32xf32, #tpu.memory_space<vmem>>, vector<32x32xf32>
    tpu.vector_store %arg1[%c96, %c0_5], %1 {strides = array<i32>} : memref<224x32xf32, #tpu.memory_space<vmem>>, vector<32x32xf32>,
    %c128 = arith.constant 128 : index
    %c0_6 = arith.constant 0 : index
    %6 = vector.load %arg1[%c128, %c0_6] : memref<224x32xf32, #tpu.memory_space<vmem>>, vector<32x32xf32>
    tpu.vector_store %arg1[%c128, %c0_6], %1 {strides = array<i32>} : memref<224x32xf32, #tpu.memory_space<vmem>>, vector<32x32xf32>,
    %c160 = arith.constant 160 : index
    %c0_7 = arith.constant 0 : index
    %7 = vector.load %arg1[%c160, %c0_7] : memref<224x32xf32, #tpu.memory_space<vmem>>, vector<32x32xf32>
    tpu.vector_store %arg1[%c160, %c0_7], %1 {strides = array<i32>} : memref<224x32xf32, #tpu.memory_space<vmem>>, vector<32x32xf32>,
    %c192 = arith.constant 192 : index
    %c0_8 = arith.constant 0 : index
    %8 = vector.load %arg1[%c192, %c0_8] : memref<224x32xf32, #tpu.memory_space<vmem>>, vector<32x32xf32>
    tpu.vector_store %arg1[%c192, %c0_8], %1 {strides = array<i32>} : memref<224x32xf32, #tpu.memory_space<vmem>>, vector<32x32xf32>,
    return
  }
}

</mosaic_0001>

<bundles_post_ra>
// kernel: tpu_custom_call.1
= control target key start
LH: loop header
LB: loop body
LE: loop exit
PB: predicated region body
PF: predicated region fallthrough
CT: control target
= control target key end

     0   :  { %6 = vsyncpa [#allocation3], 0  ;;  %s222_s6 = smov [#allocation2]   ;;  %s363_s0 = inlined_call_operand.hbm [shape: f32[32,32], index: 0, kind: input, shape index: {}]   ;;  %s364_s1 = inlined_call_operand.vmem [shape: f32[224,32], index: 1, kind: output, shape index: {}]  }
   0x1   :  { %s12_s7 = sshll.u32 %s222_s6, 4  ;;  %s198_s10 = scalar_lea.hbm %s363_s0, 512  ;;  %s13_s7 = int_to_ptr.vmem [resolvable:$true] %s12_s7 }
   0x2   :  { %p199_p0 = scmp.ne.s32.totalorder %s363_s0, %s198_s10  ;;  %p202_p1 = scmp.lt.u32.totalorder %s198_s10, %s363_s0 }
   0x4   :  { %p204_p2 = pnand %p202_p1, %p199_p0 }
   0x6   :  { %207 = shalt.err (!%p204_p2)
}
   0x7   :  { %s208_s15 = scalar_lea.vmem %s13_s7, 512  ;;  %p213_p4 = scmp.lt.s32.totalorder %s13_s7, %s13_s7 }
   0x8   :  { %p209_p3 = scmp.ne.s32.totalorder %s13_s7, %s208_s15  ;;  %p214_p5 = scmp.lt.s32.totalorder %s208_s15, %s208_s15 }
   0xa   :  { %p215_p6 = por %p214_p5, %p213_p4 }
   0xc   :  { %p216_p7 = pnand %p215_p6, %p209_p3 }
   0xe   :  { %219 = shalt.err (!%p216_p7)
}
   0xf   :  { %s223_s16 = smov 128   ;;  %s224_s17 = smov 8  }
  0x10   :  { %18 = dma.hbm_to_vmem [thread:$0]  %s363_s0, 512, %s13_s7, [#allocation3], %s223_s16, %s223_s16, %s224_s17  }
  0x11   :  { %220 = dma.done.wait [#allocation3], 512  }
  0x12   :  { %221 = vsyncadd [#allocation3], 4294966784  ;;  %vm26_vm0 = vcmask 261120   ;;  %v22_v0 = vld [vmem:[#allocation2] sm:$0xff]  ;;  %v23_v1 = vld [vmem:[#allocation2 + $0x8] sm:$0xff] }
  0x13   :  { %v24_v2 = vld [vmem:[#allocation2 + $0x10] sm:$0xff]  ;;  %v183_v3 = vpack.c.bf16 %v23_v1, %v22_v0  ;;  %v25_v4 = vld [vmem:[#allocation2 + $0x18] sm:$0xff]  ;;  %177 = vmatprep.mubr.msk.f32.mxu0 %vm26_vm0, %v22_v0 }
  0x14   :  { %180 = vmatprep.mubr.msk.f32.mxu1 %vm26_vm0, %v24_v2  ;;  %v187_v5 = vpack.c.bf16 %v25_v4, %v24_v2 }
  0x15   :  { %184 = vmatprep.subr.bf16.mxu0 %v183_v3  ;;  %191 = vmatprep.subr.bf16.mxu1 %v183_v3 }
  0x16   :  { %186 = vmatpush3.bf16.msra.mxu0 %v183_v3  ;;  %193 = vmatpush3.bf16.msra.mxu1 %v183_v3 }
  0x17   :  { %188 = vmatprep.subr.bf16.mxu0 %v187_v5  ;;  %192 = vmatprep.subr.bf16.mxu1 %v187_v5 }
  0x1a   :  { %190 = vmatpush3.bf16.msra.mxu0 %v187_v5  ;;  %194 = vmatpush3.bf16.msra.mxu1 %v187_v5 }
  0x1d   :  { %178 = vmatmul.mubr.msk.f32.vlgmr.msra.gmra.mrb[0].mxu0 %vm26_vm0, %v23_v1  ;;  %181 = vmatmul.mubr.msk.f32.vlgmr.msra.gmra.mrb[0].mxu1 %vm26_vm0, %v25_v4 }
  0xf0   :  { %v179_v6 = vpop.f32.mrb[0].mxu0  ;;  %v182_v7 = vpop.f32.mrb[0].mxu1 }
  0xf1   :  { %125 = vst.msk [vmem:[%s364_s1 + $0x8] sm:$0xff] %vm26_vm0, %v179_v6  ;;  %129 = vst.msk [vmem:[%s364_s1 + $0x28] sm:$0xff] %vm26_vm0, %v179_v6  ;;  %v105_v8 = vpop.f32.mrb[1].mxu0  ;;  %v115_v9 = vpop.f32.mrb[1].mxu1 }
  0xf2   :  { %133 = vst.msk [vmem:[%s364_s1 + $0x48] sm:$0xff] %vm26_vm0, %v179_v6  ;;  %137 = vst.msk [vmem:[%s364_s1 + $0x68] sm:$0xff] %vm26_vm0, %v179_v6 }
  0xf3   :  { %141 = vst.msk [vmem:[%s364_s1 + $0x88] sm:$0xff] %vm26_vm0, %v179_v6  ;;  %145 = vst.msk [vmem:[%s364_s1 + $0xa8] sm:$0xff] %vm26_vm0, %v179_v6 }
  0xf4   :  { %149 = vst.msk [vmem:[%s364_s1 + $0xc8] sm:$0xff] %vm26_vm0, %v179_v6  ;;  %127 = vst.msk [vmem:[%s364_s1 + $0x18] sm:$0xff] %vm26_vm0, %v182_v7 }
  0xf5   :  { %131 = vst.msk [vmem:[%s364_s1 + $0x38] sm:$0xff] %vm26_vm0, %v182_v7  ;;  %135 = vst.msk [vmem:[%s364_s1 + $0x58] sm:$0xff] %vm26_vm0, %v182_v7 }
  0xf6   :  { %139 = vst.msk [vmem:[%s364_s1 + $0x78] sm:$0xff] %vm26_vm0, %v182_v7  ;;  %143 = vst.msk [vmem:[%s364_s1 + $0x98] sm:$0xff] %vm26_vm0, %v182_v7 }
  0xf7   :  { %147 = vst.msk [vmem:[%s364_s1 + $0xb8] sm:$0xff] %vm26_vm0, %v182_v7  ;;  %151 = vst.msk [vmem:[%s364_s1 + $0xd8] sm:$0xff] %vm26_vm0, %v182_v7 }
  0xf8   :  { %124 = vst.msk [vmem:[%s364_s1] sm:$0xff] %vm26_vm0, %v105_v8  ;;  %128 = vst.msk [vmem:[%s364_s1 + $0x20] sm:$0xff] %vm26_vm0, %v105_v8 }
  0xf9   :  { %132 = vst.msk [vmem:[%s364_s1 + $0x40] sm:$0xff] %vm26_vm0, %v105_v8  ;;  %136 = vst.msk [vmem:[%s364_s1 + $0x60] sm:$0xff] %vm26_vm0, %v105_v8 }
  0xfa   :  { %140 = vst.msk [vmem:[%s364_s1 + $0x80] sm:$0xff] %vm26_vm0, %v105_v8  ;;  %144 = vst.msk [vmem:[%s364_s1 + $0xa0] sm:$0xff] %vm26_vm0, %v105_v8 }
  0xfb   :  { %148 = vst.msk [vmem:[%s364_s1 + $0xc0] sm:$0xff] %vm26_vm0, %v105_v8  ;;  %126 = vst.msk [vmem:[%s364_s1 + $0x10] sm:$0xff] %vm26_vm0, %v115_v9 }
  0xfc   :  { %130 = vst.msk [vmem:[%s364_s1 + $0x30] sm:$0xff] %vm26_vm0, %v115_v9  ;;  %134 = vst.msk [vmem:[%s364_s1 + $0x50] sm:$0xff] %vm26_vm0, %v115_v9 }
  0xfd   :  { %138 = vst.msk [vmem:[%s364_s1 + $0x70] sm:$0xff] %vm26_vm0, %v115_v9  ;;  %142 = vst.msk [vmem:[%s364_s1 + $0x90] sm:$0xff] %vm26_vm0, %v115_v9 }
  0xfe   :  { %146 = vst.msk [vmem:[%s364_s1 + $0xb0] sm:$0xff] %vm26_vm0, %v115_v9  ;;  %150 = vst.msk [vmem:[%s364_s1 + $0xd0] sm:$0xff] %vm26_vm0, %v115_v9 }
  0xff   :  { %156 = vsyncpa [#allocation3], 1 }

</bundles_post_ra>
